<compile_context>
chip_gen: v7x
topology: tpu7x:2x2x1
jax: 0.10.0
libtpu: 0.0.40
codegen_flags: <defaults>
</compile_context>

<pallas_src>
import math
import jax
import jax.numpy as jnp
from jax.experimental import pallas as pl
from jax.experimental.pallas import tpu as pltpu


def _round_up(x, m):
    return (x + m - 1) // m * m


def ffn_kernel(x_ref, w1_ref, b1_ref, w2_ref, b2_ref, o_ref, acc_ref):
    # grid = (M tiles, d_ff tiles); axis 1 is the fc1-output / fc2-contraction
    # axis, accumulated into acc_ref (f32, resident across j for a given i).
    j = pl.program_id(1)

    @pl.when(j == 0)
    def _init():
        # Seed the accumulator with the fc2 bias (added exactly once).
        acc_ref[...] = jnp.broadcast_to(
            b2_ref[...].astype(jnp.float32), acc_ref.shape)

    # fc1 slice: (tm, d_model) @ (d_model, tf) -> (tm, tf), bf16 in / f32 acc.
    h = jnp.dot(x_ref[...], w1_ref[...], preferred_element_type=jnp.float32)
    h = jnp.maximum(h + b1_ref[...].astype(jnp.float32), 0.0)  # bias + ReLU in f32

    # fc2 partial: (tm, tf) @ (tf, d_model), accumulated over j in f32.
    acc_ref[...] += jnp.dot(h.astype(w2_ref.dtype), w2_ref[...],
                            preferred_element_type=jnp.float32)

    @pl.when(j == pl.num_programs(1) - 1)
    def _finalize():
        # TODO(synk): training-mode dropout would use pltpu.prng_seed +
        # pltpu.stateful_bernoulli here; inference dropout is identity.
        o_ref[...] = acc_ref[...].astype(o_ref.dtype)


def position_wise_network(x, w1, b1, w2, b2, *, tm=256, tf=512,
                          compute_dtype=jnp.bfloat16):
    """y = fc2(relu(fc1(x))), dropout in eval mode (identity).

    x: (batch, seq, d_model); w1: (d_model, d_ff); w2: (d_ff, d_model).
    Weights are stored (in_features, out_features), i.e. transposed relative
    to PyTorch's nn.Linear.weight, so the kernel computes x @ W + b.
    """
    batch, seq, d_model = x.shape
    d_ff = w1.shape[1]
    M = batch * seq

    # Row tile: large for MXU utilization; shrink + pad for small inputs.
    tm_eff = min(tm, _round_up(M, 8))
    M_pad = _round_up(M, tm_eff)

    # d_ff tile: caps resident weight slices + intermediate h, independent of d_ff.
    tf_eff = min(tf, d_ff)
    if d_ff % tf_eff != 0:
        tf_eff = d_ff

    out_dtype = x.dtype

    x2 = x.reshape(M, d_model).astype(compute_dtype)
    if M_pad != M:
        x2 = jnp.pad(x2, ((0, M_pad - M), (0, 0)))
    w1c = w1.astype(compute_dtype)
    w2c = w2.astype(compute_dtype)
    b1_2 = b1.reshape(1, d_ff).astype(jnp.float32)
    b2_2 = b2.reshape(1, d_model).astype(jnp.float32)

    grid = (M_pad // tm_eff, d_ff // tf_eff)

    itemsize = jnp.dtype(compute_dtype).itemsize
    cost = pl.CostEstimate(
        flops=4 * M_pad * d_model * d_ff,                 # two matmuls
        transcendentals=0,
        bytes_accessed=(M_pad * d_model * itemsize        # x
                        + 2 * d_model * d_ff * itemsize   # W1, W2
                        + (d_ff + d_model) * 4            # biases
                        + M_pad * d_model * jnp.dtype(out_dtype).itemsize),
    )

    out = pl.pallas_call(
        ffn_kernel,
        out_shape=jax.ShapeDtypeStruct((M_pad, d_model), out_dtype),
        grid_spec=pltpu.PrefetchScalarGridSpec(
            num_scalar_prefetch=0,
            grid=grid,
            in_specs=[
                pl.BlockSpec((tm_eff, d_model), lambda i, j: (i, 0)),   # x tile
                pl.BlockSpec((d_model, tf_eff), lambda i, j: (0, j)),   # W1 slice
                pl.BlockSpec((1, tf_eff), lambda i, j: (0, j)),         # b1 slice
                pl.BlockSpec((tf_eff, d_model), lambda i, j: (j, 0)),   # W2 slice
                pl.BlockSpec((1, d_model), lambda i, j: (0, 0)),        # b2
            ],
            out_specs=pl.BlockSpec((tm_eff, d_model), lambda i, j: (i, 0)),
            scratch_shapes=[pltpu.VMEM((tm_eff, d_model), jnp.float32)],
        ),
        compiler_params=pltpu.CompilerParams(
            dimension_semantics=("parallel", "arbitrary"),
            vmem_limit_bytes=64 * 1024 * 1024,
        ),
        cost_estimate=cost,
    )(x2, w1c, b1_2, w2c, b2_2)

    if M_pad != M:
        out = out[:M]
    return out.reshape(batch, seq, d_model)


def init_params(key, d_model, d_ff, dtype=jnp.float32):
    """Deterministic init matching nn.Linear's U(-1/sqrt(fan_in), 1/sqrt(fan_in))."""
    k1, k2, k3, k4 = jax.random.split(key, 4)
    bound1 = 1.0 / math.sqrt(d_model)
    bound2 = 1.0 / math.sqrt(d_ff)
    w1 = jax.random.uniform(k1, (d_model, d_ff), dtype, -bound1, bound1)
    b1 = jax.random.uniform(k2, (d_ff,), dtype, -bound1, bound1)
    w2 = jax.random.uniform(k3, (d_ff, d_model), dtype, -bound2, bound2)
    b2 = jax.random.uniform(k4, (d_model,), dtype, -bound2, bound2)
    return w1, b1, w2, b2


if __name__ == "__main__":
    # Small but representative shapes: lane-dense d_model (multiple of 128),
    # d_ff large enough to exercise the d_ff-tiled accumulation (2 j-steps),
    # and seq chosen so the M-padding path is exercised (M=18 -> padded 24).
    batch, seq, d_model, d_ff = 2, 9, 128, 1024

    key = jax.random.PRNGKey(0)
    kx, kp = jax.random.split(key)
    x = jax.random.normal(kx, (batch, seq, d_model), jnp.float32)
    w1, b1, w2, b2 = init_params(kp, d_model, d_ff)

    y = position_wise_network(x, w1, b1, w2, b2)
    y = jax.block_until_ready(y)

    # Reference in plain JAX with the same bf16 operand rounding / f32 accumulation.
    xb = x.astype(jnp.bfloat16).astype(jnp.float32).reshape(-1, d_model)
    w1b = w1.astype(jnp.bfloat16).astype(jnp.float32)
    w2b = w2.astype(jnp.bfloat16).astype(jnp.float32)
    h_ref = jnp.maximum(xb @ w1b + b1, 0.0)
    h_ref = h_ref.astype(jnp.bfloat16).astype(jnp.float32)
    ref = (h_ref @ w2b + b2).reshape(batch, seq, d_model)
    assert jnp.allclose(y, ref, atol=2e-2, rtol=2e-2), "mismatch vs reference"
    assert y.shape == (batch, seq, d_model)

    print("KERNEL_OK")
</pallas_src>

<mosaic_0001>
module attributes {stable_mosaic.version = 11 : i64} {
  func.func @ffn_kernel(%arg0: i32, %arg1: i32, %arg2: memref<24x128xbf16, #tpu.memory_space<vmem>>, %arg3: memref<128x512xbf16, #tpu.memory_space<vmem>>, %arg4: memref<1x512xf32, #tpu.memory_space<vmem>>, %arg5: memref<512x128xbf16, #tpu.memory_space<vmem>>, %arg6: memref<1x128xf32, #tpu.memory_space<vmem>>, %arg7: memref<24x128xf32, #tpu.memory_space<vmem>>, %arg8: memref<24x128xf32, #tpu.memory_space<vmem>>) attributes {dimension_semantics = [#tpu.dimension_semantics<parallel>, #tpu.dimension_semantics<arbitrary>], iteration_bounds = array<i64: 1, 2>, scalar_prefetch = 0 : i64, scratch_operands = 1 : i64, tpu.core_type = #tpu.core_type<tc>, window_params = [{transform_indices = @transform_0, window_bounds = array<i64: 24, 128>}, {transform_indices = @transform_1, window_bounds = array<i64: 128, 512>}, {transform_indices = @transform_2, window_bounds = array<i64: 1, 512>}, {transform_indices = @transform_3, window_bounds = array<i64: 512, 128>}, {pipeline_mode = #tpu.pipeline_mode<synchronous>, transform_indices = @transform_4, window_bounds = array<i64: 1, 128>}, {transform_indices = @transform_5, window_bounds = array<i64: 24, 128>}]} {
    %c0_i32 = arith.constant 0 : i32
    %0 = arith.cmpi eq, %arg1, %c0_i32 : i32
    %1 = arith.extui %0 : i1 to i32
    %c0_i32_0 = arith.constant 0 : i32
    %2 = arith.cmpi ne, %1, %c0_i32_0 : i32
    scf.if %2 {
      %c0_15 = arith.constant 0 : index
      %c0_16 = arith.constant 0 : index
      %20 = vector.load %arg6[%c0_15, %c0_16] : memref<1x128xf32, #tpu.memory_space<vmem>>, vector<1x128xf32>
      %21 = vector.shape_cast %20 : vector<1x128xf32> to vector<1x128xf32>
      %22 = vector.broadcast %21 : vector<1x128xf32> to vector<24x128xf32>
      %c0_17 = arith.constant 0 : index
      %c0_18 = arith.constant 0 : index
      %23 = vector.load %arg8[%c0_17, %c0_18] : memref<24x128xf32, #tpu.memory_space<vmem>>, vector<24x128xf32>
      tpu.vector_store %arg8[%c0_17, %c0_18], %22 {strides = array<i32>} : memref<24x128xf32, #tpu.memory_space<vmem>>, vector<24x128xf32>,
    } else {
    }
    %c0 = arith.constant 0 : index
    %c0_1 = arith.constant 0 : index
    %3 = vector.load %arg2[%c0, %c0_1] : memref<24x128xbf16, #tpu.memory_space<vmem>>, vector<24x128xbf16>
    %c0_2 = arith.constant 0 : index
    %c0_3 = arith.constant 0 : index
    %4 = vector.load %arg3[%c0_2, %c0_3] : memref<128x512xbf16, #tpu.memory_space<vmem>>, vector<128x512xbf16>
    %cst = arith.constant dense<0.000000e+00> : vector<24x512xf32>
    %5 = tpu.matmul %3, %4, %cst {dimension_numbers = #tpu.dot_dimension_numbers<[1], [0], [0], [1], [0, 0, 1, 1], [], []>} : vector<24x128xbf16>, vector<128x512xbf16>, vector<24x512xf32> -> vector<24x512xf32>
    %c0_4 = arith.constant 0 : index
    %c0_5 = arith.constant 0 : index
    %6 = vector.load %arg4[%c0_4, %c0_5] : memref<1x512xf32, #tpu.memory_space<vmem>>, vector<1x512xf32>
    %7 = vector.broadcast %6 : vector<1x512xf32> to vector<24x512xf32>
    %8 = arith.addf %5, %7 : vector<24x512xf32>
    %cst_6 = arith.constant 0.000000e+00 : f32
    %9 = vector.broadcast %cst_6 : f32 to vector<24x512xf32>
    %10 = arith.maximumf %8, %9 : vector<24x512xf32>
    %c0_7 = arith.constant 0 : index
    %c0_8 = arith.constant 0 : index
    %11 = vector.load %arg8[%c0_7, %c0_8] : memref<24x128xf32, #tpu.memory_space<vmem>>, vector<24x128xf32>
    %12 = arith.truncf %10 : vector<24x512xf32> to vector<24x512xbf16>
    %c0_9 = arith.constant 0 : index
    %c0_10 = arith.constant 0 : index
    %13 = vector.load %arg5[%c0_9, %c0_10] : memref<512x128xbf16, #tpu.memory_space<vmem>>, vector<512x128xbf16>
    %cst_11 = arith.constant dense<0.000000e+00> : vector<24x128xf32>
    %14 = tpu.matmul %12, %13, %cst_11 {dimension_numbers = #tpu.dot_dimension_numbers<[1], [0], [0], [1], [0, 0, 1, 1], [], []>} : vector<24x512xbf16>, vector<512x128xbf16>, vector<24x128xf32> -> vector<24x128xf32>
    %15 = arith.addf %11, %14 : vector<24x128xf32>
    %c0_12 = arith.constant 0 : index
    %c0_13 = arith.constant 0 : index
    %16 = vector.load %arg8[%c0_12, %c0_13] : memref<24x128xf32, #tpu.memory_space<vmem>>, vector<24x128xf32>
    tpu.vector_store %arg8[%c0_12, %c0_13], %15 {strides = array<i32>} : memref<24x128xf32, #tpu.memory_space<vmem>>, vector<24x128xf32>,
    %c1_i32 = arith.constant 1 : i32
    %17 = arith.cmpi eq, %arg1, %c1_i32 : i32
    %18 = arith.extui %17 : i1 to i32
    %c0_i32_14 = arith.constant 0 : i32
    %19 = arith.cmpi ne, %18, %c0_i32_14 : i32
    scf.if %19 {
      %c0_15 = arith.constant 0 : index
      %c0_16 = arith.constant 0 : index
      %20 = vector.load %arg8[%c0_15, %c0_16] : memref<24x128xf32, #tpu.memory_space<vmem>>, vector<24x128xf32>
      %c0_17 = arith.constant 0 : index
      %c0_18 = arith.constant 0 : index
      %21 = vector.load %arg7[%c0_17, %c0_18] : memref<24x128xf32, #tpu.memory_space<vmem>>, vector<24x128xf32>
      tpu.vector_store %arg7[%c0_17, %c0_18], %20 {strides = array<i32>} : memref<24x128xf32, #tpu.memory_space<vmem>>, vector<24x128xf32>,
    } else {
    }
    return
  }
  func.func @transform_0(%arg0: i32, %arg1: i32) -> (i32, i32) {
    %c0_i32 = arith.constant 0 : i32
    %c0_i32_0 = arith.constant 0 : i32
    return %arg0, %c0_i32 : i32, i32
  }
  func.func @transform_1(%arg0: i32, %arg1: i32) -> (i32, i32) {
    %c0_i32 = arith.constant 0 : i32
    %c0_i32_0 = arith.constant 0 : i32
    return %c0_i32, %arg1 : i32, i32
  }
  func.func @transform_2(%arg0: i32, %arg1: i32) -> (i32, i32) {
    %c0_i32 = arith.constant 0 : i32
    %c0_i32_0 = arith.constant 0 : i32
    return %c0_i32, %arg1 : i32, i32
  }
  func.func @transform_3(%arg0: i32, %arg1: i32) -> (i32, i32) {
    %c0_i32 = arith.constant 0 : i32
    %c0_i32_0 = arith.constant 0 : i32
    return %arg1, %c0_i32 : i32, i32
  }
  func.func @transform_4(%arg0: i32, %arg1: i32) -> (i32, i32) {
    %c0_i32 = arith.constant 0 : i32
    %c0_i32_0 = arith.constant 0 : i32
    %c0_i32_1 = arith.constant 0 : i32
    return %c0_i32, %c0_i32_0 : i32, i32
  }
  func.func @transform_5(%arg0: i32, %arg1: i32) -> (i32, i32) {
    %c0_i32 = arith.constant 0 : i32
    %c0_i32_0 = arith.constant 0 : i32
    return %arg0, %c0_i32 : i32, i32
  }
}

</mosaic_0001>

<bundles_post_ra>
// kernel: tpu_custom_call.1
= control target key start
LH: loop header
LB: loop body
LE: loop exit
PB: predicated region body
PF: predicated region fallthrough
CT: control target
= control target key end

     0   :  { %s2224_s0 = inlined_call_operand.hbm [shape: bf16[24,128], index: 0, kind: input, shape index: {}]   ;;  %s2225_s1 = inlined_call_operand.hbm [shape: bf16[128,1024], index: 1, kind: input, shape index: {}]   ;;  %s2226_s2 = inlined_call_operand.hbm [shape: f32[1,1024], index: 2, kind: input, shape index: {}]   ;;  %s2227_s3 = inlined_call_operand.hbm [shape: bf16[1024,128], index: 3, kind: input, shape index: {}]   ;;  %s2228_s4 = inlined_call_operand.hbm [shape: f32[1,128], index: 4, kind: input, shape index: {}]   ;;  %s2229_s5 = inlined_call_operand.hbm [shape: f32[24,128], index: 5, kind: output, shape index: {}]  }
   0x1   :  { %2244 = sst [smem:[#allocation21_spill]] %s2225_s1 }
   0x2   :  { %2245 = sst [smem:[#allocation22_spill]] %s2228_s4 }
   0x3   :  { %2246 = sst [smem:[#allocation23_spill]] %s2229_s5 }
   0x4   :  { %10 = vsyncpa [#allocation4], 0 }
   0x5   :  { %11 = vsyncpa [#allocation7], 0 }
   0x6   :  { %13 = vsyncpa [#allocation7 + $0x1], 0 }
   0x7   :  { %14 = vsyncpa [#allocation10], 0 }
   0x8   :  { %16 = vsyncpa [#allocation10 + $0x1], 0 }
   0x9   :  { %17 = vsyncpa [#allocation5], 0  ;;  %s1856_s18 = smov 0   ;;  %s1858_s19 = smov 0  }
   0xa   :  { %s1860_s20 = smov 0   ;;  %s1862_s21 = smov 0  }
   0xb   :  { %s1864_s22 = smov 0   ;;  %s1866_s23 = smov 0  }
   0xc LB: > { %2247 = sst [smem:[#allocation18_spill]] %s1802_s21  ;;  %s1885_s24 = sadd.s32 4294967295, %s1810_s23   ;;  %s1810_s23 = sphi %s1866_s23, %s23_s23   ;;  %s1806_s22 = sphi %s1864_s22, %s2280_s22   ;;  %s1802_s21 = sphi %s1862_s21, %s2279_s21   ;;  %s1798_s20 = sphi %s1860_s20, %s2278_s20   ;;  %s1794_s19 = sphi %s1858_s19, %s2277_s19   ;;  %s1790_s18 = sphi %s1856_s18, %s2276_s18  }
   0xd   : > { %s68_s25 = sadd.s32 1, %s1798_s20  ;;  %p75_p0 = scmp.ne.s32.totalorder %s1798_s20, %s1794_s19 }
   0xe   : > { %p76_p1 = scmp.eq.s32.totalorder %s1810_s23, 0  ;;  %p81_p2 = scmp.ne.s32.totalorder %s1794_s19, %s1790_s18 }
   0xf   : > { %p2230_p3 = scmp.eq.s32.totalorder %s1885_s24, 0  ;;  %p1238_p5 = scmp.ge.s32.totalorder %s1810_s23, 1 }
  0x10   : > { %p77_p4 = por %p76_p1, %p75_p0  ;;  %p191_p7 = scmp.lt.s32.totalorder %s1810_s23, 3 }
  0x11   : > { %p1896_p6 = por %p2230_p3, %p81_p2  ;;  %s1812_s28 = smov [#allocation11]  }
  0x12   : > { %p1901_p8 = pnand %p1238_p5, %p191_p7  ;;  %s220_s29 = sshll.u32 %s1812_s28, 4  ;;  %s221_s29 = int_to_ptr.vmem [resolvable:$true] %s220_s29 }
  0x13   : > { %s2248_s26 = scalar_select %p1896_p6, 1, 0 }
  0x14   : > { %s2249_s27 = scalar_select %p1901_p8, 1, 0 }
  0x15   : > { %p1407_p9 = pneg %p1901_p8  ;;  %p1426_p10 = scmp.lt.s32.totalorder %s1810_s23, 2 }
  0x16   : > { %s2234_s30 = sand.u32 1, %s1810_s23   ;;  %s2252_s4 = sld [smem:[#allocation22_spill]] }
  0x17   : > { %p1911_p11 = pnand %p1407_p9, %p2230_p3  ;;  %p1915_p12 = pnand %p1426_p10, %p77_p4 }
  0x19   : > { %s2250_s6 = scalar_select %p1911_p11, 1, 0 }
  0x1a   : > { %s2251_s7 = scalar_select %p1915_p12, 1, 0 }
  0x1b   : > { %p2235_p0 = pneg %p1911_p11 }
  0x1c   : > { %s1572_s10 = scalar_lea.hbm %s2252_s4, 16 }
  0x1d   : > { %p1573_p13 = scmp.ne.s32.totalorder %s2252_s4, %s1572_s10  ;;  %p1579_p4 = scmp.lt.u32.totalorder %s1572_s10, %s2252_s4 }
  0x1f   : > { %p1575_p1 = pnand %p2235_p0, %p1573_p13 }
  0x21   : > { %p1576_p2 = pneg %p1575_p1 }
  0x23   : > { %p1581_p5 = pnand %p1579_p4, %p1576_p2 }
  0x25   : > { %1584 = shalt.err (!%p1581_p5)
}
  0x26   : > { %s1585_s15 = scalar_lea.vmem %s221_s29, 16  ;;  %s1592_s16 = scalar_lea.vmem %s221_s29, 32 }
  0x27   : > { %p1586_p7 = scmp.ne.s32.totalorder %s221_s29, %s1585_s15  ;;  %p1593_p3 = scmp.lt.s32.totalorder %s221_s29, %s221_s29 }
  0x28   : > { %p1594_p6 = scmp.lt.s32.totalorder %s1592_s16, %s1585_s15 }
  0x29   : > { %p1588_p9 = pnand %p1586_p7, %p2235_p0 }
  0x2a   : > { %p1595_p8 = por %p1594_p6, %p1593_p3 }
  0x2b   : > { %p1589_p10 = pneg %p1588_p9 }
  0x2d   : > { %p1596_p12 = pnand %p1595_p8, %p1589_p10 }
  0x2f   : > { %1599 = shalt.err (!%p1596_p12)
}
  0x30   : > { %1413 = dma.hbm_to_vmem [thread:$0]  (!%p1911_p11), %s2252_s4, 16, %s221_s29, [#allocation10]  }
  0x31   : > { %s32_s28 = sadd.s32 1, %s1806_s22  ;;  %s2238_s8 = sand.u32 1, %s1798_s20  }
  0x32   : > { %p33_p3 = scmp.ge.s32.totalorder %s32_s28, 2  ;;  %s1945_s9 = sshll.u32 %s2238_s8, 8 }
  0x33   : > { %s1330_s10 = sshll.u32 %s1806_s22, 8  ;;  %s2254_s1 = sld [smem:[#allocation21_spill]] }
  0x34   : > { %s2282_s28 = smov (%p33_p3, %s32_s28), 0  ;;  %s235_s29 = scalar_lea.vmem [#allocation6], %s1945_s9 }
  0x35   : > { %2253 = sst [smem:[#allocation19_spill]] %s2282_s28  ;;  %s242_s14 = sshll.u32 %s235_s29, 4  ;;  %s1958_s14 = int_to_ptr.vmem [resolvable:$true] %s242_s14 }
  0x36   : > { %s65_s15 = ssub.s32 %s1806_s22, %s2282_s28  ;;  %s1967_s17 = scalar_lea.sflag [#allocation7], %s2234_s30 }
  0x37   : > { %p66_p6 = scmp.eq.s32.totalorder %s65_s15, 0  ;;  %p2256_p12 = scmp.ne.s32.totalorder %s2251_s7, 0 }
  0x39   : > { %s1953_s13 = scalar_lea.hbm %s2254_s1, %s1330_s10  ;;  %p1973_p13 = pneg %p2256_p12 }
  0x3a   : > { %s1963_s16 = scalar_select %p66_p6, %s1798_s20, %s68_s25  }
  0x3b   : > { %s1600_s18 = scalar_lea.hbm %s1953_s13, 4096  ;;  %s1605_s29 = scalar_lea.hbm %s2254_s1, 8192 }
  0x3c   : > { %2255 = sst [smem:[#allocation20_spill]] %s1963_s16  ;;  %p1601_p8 = scmp.ne.s32.totalorder %s1953_s13, %s1600_s18 }
  0x3d   : > { %s2257_s10 = scalar_select %p1973_p13, 1, 0 }
  0x3e   : > { %p1603_p1 = pnand %p1973_p13, %p1601_p8  ;;  %p1606_p4 = scmp.lt.u32.totalorder %s1953_s13, %s2254_s1 }
  0x3f   : > { %p1607_p5 = scmp.lt.u32.totalorder %s1605_s29, %s1600_s18  ;;  %p1609_p9 = scmp.lt.u32.totalorder %s1600_s18, %s1953_s13 }
  0x40   : > { %p1604_p2 = pneg %p1603_p1 }
  0x41   : > { %p1608_p7 = por %p1607_p5, %p1606_p4 }
  0x43   : > { %p1610_p10 = por %p1609_p9, %p1608_p7 }
  0x45   : > { %p1611_p3 = pnand %p1610_p10, %p1604_p2 }
  0x47   : > { %1614 = shalt.err (!%p1611_p3)
}
  0x48   : > { %s1615_s30 = scalar_lea.vmem %s1958_s14, 4096  ;;  %s1813_s11 = smov [#allocation6]  }
  0x49   : > { %p1616_p6 = scmp.ne.s32.totalorder %s1958_s14, %s1615_s30  ;;  %s1620_s12 = sshll.u32 %s1813_s11, 4  ;;  %s1621_s12 = int_to_ptr.vmem [resolvable:$false] %s1620_s12 }
  0x4a   : > { %s1622_s25 = scalar_lea.vmem %s1621_s12, 8192  ;;  %p1623_p0 = scmp.lt.s32.totalorder %s1958_s14, %s1621_s12 }
  0x4b   : > { %p1618_p8 = pnand %p1616_p6, %p1973_p13  ;;  %p1624_p11 = scmp.lt.s32.totalorder %s1622_s25, %s1615_s30 }
  0x4d   : > { %p1619_p1 = pneg %p1618_p8  ;;  %p1625_p4 = por %p1624_p11, %p1623_p0 }
  0x4f   : > { %p1626_p5 = pnand %p1625_p4, %p1619_p1 }
  0x51   : > { %1629 = shalt.err (!%p1626_p5)
}
  0x52   : > { %s1814_s18 = smov 512   ;;  %s1815_s29 = smov 256  }
  0x53   : > { %s1816_s15 = smov 16   ;;  %s1817_s8 = smov [#allocation3]  }
  0x54   : > { %1417 = dma.hbm_to_vmem [thread:$0]  (!%p2256_p12), %s1953_s13, 4096, %s1958_s14, %s1967_s17, %s1814_s18, %s1815_s29, %s1816_s15  }
  0x55   : > { %s206_s11 = sshll.u32 %s1817_s8, 4  ;;  %s2258_s1 = sand.u32 1, %s1798_s20   ;;  %s207_s11 = int_to_ptr.vmem [resolvable:$true] %s206_s11 }
  0x56   : > { %s1245_s12 = sshll.u32 %s2258_s1, 2  ;;  %s1630_s4 = scalar_lea.hbm %s2224_s0, 192 }
  0x57   : > { %p1631_p11 = scmp.ne.s32.totalorder %s2224_s0, %s1630_s4  ;;  %p2259_p0 = scmp.ne.s32.totalorder %s2250_s6, 0 }
  0x58   : > { %p1637_p10 = scmp.lt.u32.totalorder %s1630_s4, %s2224_s0 }
  0x59   : > { %p2260_p2 = pneg %p2259_p0 }
  0x5b   : > { %p1633_p7 = pnand %p1631_p11, %p2260_p2 }
  0x5d   : > { %p1634_p9 = pneg %p1633_p7 }
  0x5f   : > { %p1639_p3 = pnand %p1637_p10, %p1634_p9 }
  0x61   : > { %1642 = shalt.err (!%p1639_p3)
}
  0x62   : > { %s1643_s8 = scalar_lea.vmem %s207_s11, 192  ;;  %p2261_p8 = pmov %p2260_p2 }
  0x63   : > { %p1644_p6 = scmp.ne.s32.totalorder %s207_s11, %s1643_s8  ;;  %p1651_p5 = scmp.lt.s32.totalorder %s207_s11, %s207_s11 }
  0x64   : > { %p1652_p12 = scmp.lt.s32.totalorder %s1643_s8, %s1643_s8 }
  0x65   : > { %p1646_p1 = pnand %p1644_p6, %p2261_p8 }
  0x66   : > { %p1653_p13 = por %p1652_p12, %p1651_p5 }
  0x67   : > { %p1647_p4 = pneg %p1646_p1 }
  0x69   : > { %p1654_p2 = pnand %p1653_p13, %p1647_p4 }
  0x6b   : > { %1657 = shalt.err (!%p1654_p2)
}
  0x6c   : > { %s1818_s1 = smov 64   ;;  %s1819_s5 = smov 4  }
  0x6d   : > { %1410 = dma.hbm_to_vmem [thread:$0]  (!%p2259_p0), %s2224_s0, 192, %s207_s11, [#allocation4], %s1818_s1, %s1818_s1, %s1819_s5  }
  0x6e   : > { %s1331_s28 = sshll.u32 %s1806_s22, 6  ;;  %s256_s18 = scalar_lea.vmem [#allocation8], %s1245_s12 }
  0x6f   : > { %s2026_s16 = scalar_lea.hbm %s2226_s2, %s1331_s28  ;;  %s264_s29 = sshll.u32 %s256_s18, 4  ;;  %s265_s29 = int_to_ptr.vmem [resolvable:$true] %s264_s29 }
  0x70   : > { %s1658_s6 = scalar_lea.hbm %s2026_s16, 64  ;;  %p2262_p13 = scmp.ne.s32.totalorder %s2257_s10, 0 }
  0x71   : > { %p1659_p12 = scmp.ne.s32.totalorder %s2026_s16, %s1658_s6  ;;  %s1663_s30 = scalar_lea.hbm %s2226_s2, 128 }
  0x72   : > { %p1664_p0 = scmp.lt.u32.totalorder %s2026_s16, %s2226_s2  ;;  %p1665_p9 = scmp.lt.u32.totalorder %s1663_s30, %s1658_s6 }
  0x73   : > { %p1661_p11 = pnand %p1659_p12, %p2262_p13  ;;  %p1667_p3 = scmp.lt.u32.totalorder %s1658_s6, %s2026_s16 }
  0x74   : > { %p1666_p10 = por %p1665_p9, %p1664_p0 }
  0x75   : > { %p1662_p7 = pneg %p1661_p11 }
  0x76   : > { %p1668_p6 = por %p1667_p3, %p1666_p10 }
  0x78   : > { %p1669_p8 = pnand %p1668_p6, %p1662_p7 }
  0x7a   : > { %1672 = shalt.err (!%p1669_p8)
}
  0x7b   : > { %s1673_s12 = scalar_lea.vmem %s265_s29, 64  ;;  %s1820_s4 = smov [#allocation8]  }
  0x7c   : > { %p1674_p1 = scmp.ne.s32.totalorder %s265_s29, %s1673_s12  ;;  %s1678_s21 = sshll.u32 %s1820_s4, 4  ;;  %s1679_s21 = int_to_ptr.vmem [resolvable:$false] %s1678_s21 }
  0x7d   : > { %s1680_s28 = scalar_lea.vmem %s1679_s21, 128  ;;  %p1681_p2 = scmp.lt.s32.totalorder %s265_s29, %s1679_s21 }
  0x7e   : > { %p1676_p4 = pnand %p1674_p1, %p2262_p13  ;;  %p1682_p12 = scmp.lt.s32.totalorder %s1680_s28, %s1673_s12 }
  0x80   : > { %p1677_p5 = pneg %p1676_p4  ;;  %p1683_p11 = por %p1682_p12, %p1681_p2 }
  0x82   : > { %p1684_p0 = pnand %p1683_p11, %p1677_p5 }
  0x84   : > { %1687 = shalt.err (!%p1684_p0)
}
  0x85   : > { %p2263_p9 = scmp.ne.s32.totalorder %s2251_s7, 0  ;;  %s1332_s13 = sshll.u32 %s1806_s22, 12 }
  0x86   : > { %s2050_s6 = scalar_lea.hbm %s2227_s3, %s1332_s13  ;;  %s275_s15 = scalar_lea.vmem [#allocation9], %s1945_s9 }
  0x87   : > { %1420 = dma.hbm_to_vmem [thread:$0]  (!%p2263_p9), %s2026_s16, 64, %s265_s29, %s1967_s17  }
  0x88   : > { %s282_s11 = sshll.u32 %s275_s15, 4  ;;  %s2264_s30 = sand.u32 1, %s1810_s23   ;;  %s2053_s11 = int_to_ptr.vmem [resolvable:$true] %s282_s11 }
  0x89   : > { %s2057_s25 = scalar_lea.sflag [#allocation10], %s2264_s30  ;;  %s1688_s8 = scalar_lea.hbm %s2050_s6, 4096 }
  0x8a   : > { %p1689_p7 = scmp.ne.s32.totalorder %s2050_s6, %s1688_s8  ;;  %s1693_s29 = scalar_lea.hbm %s2227_s3, 8192 }
  0x8b   : > { %p1694_p6 = scmp.lt.u32.totalorder %s2050_s6, %s2227_s3  ;;  %p1695_p8 = scmp.lt.u32.totalorder %s1693_s29, %s1688_s8 }
  0x8c   : > { %p1691_p10 = pnand %p1689_p7, %p2262_p13  ;;  %p1697_p4 = scmp.lt.u32.totalorder %s1688_s8, %s2050_s6 }
  0x8d   : > { %p1696_p1 = por %p1695_p8, %p1694_p6 }
  0x8e   : > { %p1692_p3 = pneg %p1691_p10 }
  0x8f   : > { %p1698_p5 = por %p1697_p4, %p1696_p1 }
  0x91   : > { %p1699_p2 = pnand %p1698_p5, %p1692_p3 }
  0x93   : > { %1702 = shalt.err (!%p1699_p2)
}
  0x94   : > { %s1703_s9 = scalar_lea.vmem %s2053_s11, 4096  ;;  %s1821_s21 = smov [#allocation9]  }
  0x95   : > { %p1704_p12 = scmp.ne.s32.totalorder %s2053_s11, %s1703_s9  ;;  %s1708_s28 = sshll.u32 %s1821_s21, 4  ;;  %s1709_s28 = int_to_ptr.vmem [resolvable:$false] %s1708_s28 }
  0x96   : > { %s1710_s13 = scalar_lea.vmem %s1709_s28, 8192  ;;  %p1711_p7 = scmp.lt.s32.totalorder %s2053_s11, %s1709_s28 }
  0x97   : > { %p1706_p11 = pnand %p1704_p12, %p2262_p13  ;;  %p1712_p10 = scmp.lt.s32.totalorder %s1710_s13, %s1703_s9 }
  0x99   : > { %p1707_p0 = pneg %p1706_p11  ;;  %p1713_p6 = por %p1712_p10, %p1711_p7 }
  0x9b   : > { %p1714_p8 = pnand %p1713_p6, %p1707_p0 }
  0x9d   : > { %1717 = shalt.err (!%p1714_p8)
}
  0x9e   : > { %1423 = dma.hbm_to_vmem [thread:$0]  (!%p2263_p9), %s2050_s6, 4096, %s2053_s11, %s2057_s25, %s1818_s1, %s1818_s1, %s1819_s5  }
  0x9f   : > { %p2265_p13 = scmp.ne.s32.totalorder %s2249_s27, 0 }
  0xa0   : > { %p2266_p3 = scmp.eq.s32.totalorder (!%p2265_p13), %s1885_s24, 0 }
  0xa1   : > { %294 = sbr.rel (%p2265_p13) target bundleno = 719 (0x2cf), region = 40 }
  0xa8   : > { %1769 = dma.done.wait (%p2266_p3), [#allocation4], 192   ;;  %p2267_p1 = pmov %p2266_p3 }
  0xa9   : > { %s300_s7 = sand.u32 1, %s1885_s24   ;;  %s302_s10 = sand.u32 1, %s1794_s19  }
  0xaa   : > { %1771 = vsyncadd (%p2267_p1), [#allocation4], 4294967104  ;;  %s1253_s14 = sshll.u32 %s302_s10, 8  ;;  %s301_s18 = scalar_lea.sflag [#allocation7], %s300_s7 }
  0xab   : > { %s2092_s15 = scalar_lea.vmem [#allocation6], %s1253_s14  ;;  %p2268_p4 = scmp.ne.s32.totalorder %s2248_s26, 0 }
  0xad   : > { %1773 = dma.done.wait (%p2268_p4), %s301_s18, 4160  }
  0xae   : > { %1775 = vsyncadd (%p2268_p4), %s301_s18, 4294963136  ;;  %s2098_s27 = sshll.u32 %s302_s10, 2  ;;  %s319_s5 = scalar_lea.sflag [#allocation10], %s300_s7 }
  0xaf   : > { %s313_s1 = scalar_lea.vmem [#allocation8], %s2098_s27  ;;  %s2101_s6 = scalar_lea.vmem [#allocation9], %s1253_s14 }
  0xb0   : > { %1777 = dma.done.wait (%p2268_p4), %s319_s5, 4096  }
  0xb1   : > { %1779 = vsyncadd (%p2268_p4), %s319_s5, 4294963200  ;;  %p2269_p9 = pmov %p2267_p1 }
  0xb2   : > { %p2270_p5 = pmov %p2267_p1 }
  0xb3   : > { %1781 = dma.done.wait (%p2269_p9), [#allocation10], 16  }
  0xb4   : > { %1783 = vsyncadd (%p2270_p5), [#allocation10], 4294967280  ;;  %s2271_s11 = sld [smem:[#allocation18_spill]] }
  0xba   : > { %p1257_p2 = scmp.ne.s32.totalorder %s2271_s11, 0 }
  0xbb   : > { %v1258_v0 = vld [vmem:[#allocation11] ss:$0 sm:$0xff] (!%p1257_p2) }
  0xbc   : > { %367 = sbr.rel (%p1257_p2) target bundleno = 195 (0xc3), region = 64  ;;  %375 = vst [vmem:[#allocation2] sm:$0xff] (!%p1257_p2), %v1258_v0  ;;  %376 = vst [vmem:[#allocation2 + $0x8] sm:$0xff] (!%p1257_p2), %v1258_v0 }
  0xbd   : > { %377 = vst [vmem:[#allocation2 + $0x10] sm:$0xff] (!%p1257_p2), %v1258_v0 }
  0xc3 PF: > { %v1490_v1 = vld [vmem:[%s2092_s15 + $0x4] ss:$16 sps:$4 sm:$0xff]   ;;  %v1492_v2 = vld [vmem:[%s2092_s15 + $0xc] ss:$16 sps:$4 sm:$0xff]   ;;  %v1822_v3 = vmov 0   ;;  %s2272_s26 = sld [smem:[#allocation18_spill]] }
  0xc4   : > { %637 = vmatprep.mubr.bf16.mxu0 %v1822_v3  ;;  %688 = vmatprep.mubr.bf16.mxu1 %v1822_v3  ;;  %v1494_v4 = vld [vmem:[%s2092_s15] ss:$16 sps:$4 sm:$0xff]   ;;  %v1495_v5 = vld [vmem:[%s2092_s15 + $0x8] ss:$16 sps:$4 sm:$0xff]   ;;  %v1496_v6 = vld [vmem:[%s2092_s15 + $0x24] ss:$16 sps:$4 sm:$0xff]  }
  0xc5   : > { %605 = vmatprep.subr.bf16.mxu0 %v1490_v1  ;;  %656 = vmatprep.subr.bf16.mxu1 %v1492_v2  ;;  %v1498_v7 = vld [vmem:[%s2092_s15 + $0x2c] ss:$16 sps:$4 sm:$0xff]   ;;  %v1500_v8 = vld [vmem:[%s2092_s15 + $0x20] ss:$16 sps:$4 sm:$0xff]   ;;  %v1501_v9 = vld [vmem:[%s2092_s15 + $0x28] ss:$16 sps:$4 sm:$0xff]  }
  0xc6   : > { %606 = vmatpush1.bf16.msra.mxu0 %v1494_v4  ;;  %657 = vmatpush1.bf16.msra.mxu1 %v1495_v5  ;;  %v1502_v10 = vld [vmem:[%s2092_s15 + $0x44] ss:$16 sps:$4 sm:$0xff]   ;;  %v1504_v11 = vld [vmem:[%s2092_s15 + $0x4c] ss:$16 sps:$4 sm:$0xff]   ;;  %v1506_v12 = vld [vmem:[%s2092_s15 + $0x40] ss:$16 sps:$4 sm:$0xff]   ;;  %v415_v4 = vlaneseq }
  0xc7   : > { %607 = vmatprep.subr.bf16.mxu0 %v1496_v6  ;;  %658 = vmatprep.subr.bf16.mxu1 %v1498_v7  ;;  %v1507_v13 = vld [vmem:[%s2092_s15 + $0x48] ss:$16 sps:$4 sm:$0xff]   ;;  %v1508_v14 = vld [vmem:[%s2092_s15 + $0x64] ss:$16 sps:$4 sm:$0xff]   ;;  %v1510_v15 = vld [vmem:[%s2092_s15 + $0x6c] ss:$16 sps:$4 sm:$0xff]  }
  0xc8   : > { %v1512_v16 = vld [vmem:[%s2092_s15 + $0x60] ss:$16 sps:$4 sm:$0xff]   ;;  %v1513_v17 = vld [vmem:[%s2092_s15 + $0x68] ss:$16 sps:$4 sm:$0xff]   ;;  %v1514_v18 = vld [vmem:[%s2092_s15 + $0x84] ss:$16 sps:$4 sm:$0xff]  }
  0xc9   : > { %v1516_v19 = vld [vmem:[%s2092_s15 + $0x8c] ss:$16 sps:$4 sm:$0xff]   ;;  %v1518_v20 = vld [vmem:[%s2092_s15 + $0x80] ss:$16 sps:$4 sm:$0xff]   ;;  %v1519_v21 = vld [vmem:[%s2092_s15 + $0x88] ss:$16 sps:$4 sm:$0xff]  }
  0xca   : > { %608 = vmatpush1.bf16.msra.mxu0 %v1500_v8  ;;  %659 = vmatpush1.bf16.msra.mxu1 %v1501_v9  ;;  %v1520_v22 = vld [vmem:[%s2092_s15 + $0xa4] ss:$16 sps:$4 sm:$0xff]   ;;  %v1522_v23 = vld [vmem:[%s2092_s15 + $0xac] ss:$16 sps:$4 sm:$0xff]   ;;  %v1524_v24 = vld [vmem:[%s2092_s15 + $0xa0] ss:$16 sps:$4 sm:$0xff]  }
  0xcb   : > { %609 = vmatprep.subr.bf16.mxu0 %v1502_v10  ;;  %660 = vmatprep.subr.bf16.mxu1 %v1504_v11  ;;  %v1525_v25 = vld [vmem:[%s2092_s15 + $0xa8] ss:$16 sps:$4 sm:$0xff]   ;;  %v1526_v26 = vld [vmem:[%s2092_s15 + $0xc4] ss:$16 sps:$4 sm:$0xff]   ;;  %v1528_v27 = vld [vmem:[%s2092_s15 + $0xcc] ss:$16 sps:$4 sm:$0xff]  }
  0xcc   : > { %v1530_v28 = vld [vmem:[%s2092_s15 + $0xc0] ss:$16 sps:$4 sm:$0xff]   ;;  %v1531_v29 = vld [vmem:[%s2092_s15 + $0xc8] ss:$16 sps:$4 sm:$0xff]   ;;  %v1532_v30 = vld [vmem:[%s2092_s15 + $0xe4] ss:$16 sps:$4 sm:$0xff]  }
  0xcd   : > { %v1534_v31 = vld [vmem:[%s2092_s15 + $0xec] ss:$16 sps:$4 sm:$0xff]   ;;  %v1536_v32 = vld [vmem:[%s2092_s15 + $0xe0] ss:$16 sps:$4 sm:$0xff]   ;;  %v1537_v33 = vld [vmem:[%s2092_s15 + $0xe8] ss:$16 sps:$4 sm:$0xff]  }
  0xce   : > { %610 = vmatpush1.bf16.msra.mxu0 %v1506_v12  ;;  %661 = vmatpush1.bf16.msra.mxu1 %v1507_v13  ;;  %v1540_v34 = vld [vmem:[%s2101_s6 + $0x40] sm:$0xff]   ;;  %v1538_v36 = vld [vmem:[#allocation3] sm:$0xff]   ;;  %v1539_v43 = vld [vmem:[#allocation3 + $0x8] ss:$0 sps:$4 sm:$0xff]   ;;  %v416_v5 = vshrl.u32 %v415_v4, 7  ;;  %p1325_p12 = scmp.ne.s32.totalorder %s2272_s26, 1 }
  0xcf   : > { %611 = vmatprep.subr.bf16.mxu0 %v1508_v14  ;;  %662 = vmatprep.subr.bf16.mxu1 %v1510_v15  ;;  %v1541_v35 = vld [vmem:[%s2101_s6 + $0xc0] sm:$0xff]   ;;  %v1544_v39 = vld [vmem:[%s2101_s6 + $0x48] sm:$0xff]   ;;  %v1548_v44 = vld [vmem:[%s2101_s6 + $0x50] sm:$0xff]  }
  0xd0   : > { %v1542_v37 = vld [vmem:[%s2101_s6] sm:$0xff]   ;;  %v1545_v40 = vld [vmem:[%s2101_s6 + $0xc8] sm:$0xff]   ;;  %v1549_v45 = vld [vmem:[%s2101_s6 + $0xd0] sm:$0xff]   ;;  %v417_v6 = vsub.s32 0, %v416_v5  ;;  %v425_v7 = vsub.s32 2, %v416_v5  ;;  %v421_v9 = vsub.s32 1, %v416_v5 }
  0xd1   : > { %v1543_v38 = vld [vmem:[%s2101_s6 + $0x80] sm:$0xff]   ;;  %v1546_v41 = vld [vmem:[%s2101_s6 + $0x8] sm:$0xff]   ;;  %v1550_v46 = vld [vmem:[%s2101_s6 + $0x10] sm:$0xff]   ;;  %v429_v10 = vsub.s32 3, %v416_v5 }
  0xd2   : > { %612 = vmatpush1.bf16.msra.mxu0 %v1512_v16  ;;  %663 = vmatpush1.bf16.msra.mxu1 %v1513_v17  ;;  %v1547_v42 = vld [vmem:[%s2101_s6 + $0x88] sm:$0xff]   ;;  %v1551_v47 = vld [vmem:[%s2101_s6 + $0x90] sm:$0xff]   ;;  %v1552_v48 = vld [vmem:[%s2101_s6 + $0x58] sm:$0xff]  }
  0xd3   : > { %613 = vmatprep.subr.bf16.mxu0 %v1514_v18  ;;  %664 = vmatprep.subr.bf16.mxu1 %v1516_v19  ;;  %v1553_v49 = vld [vmem:[%s2101_s6 + $0xd8] sm:$0xff]   ;;  %v1556_v52 = vld [vmem:[%s2101_s6 + $0x60] sm:$0xff]   ;;  %v1560_v56 = vld [vmem:[%s2101_s6 + $0x68] sm:$0xff]  }
  0xd4   : > { %v1554_v50 = vld [vmem:[%s2101_s6 + $0x18] sm:$0xff]   ;;  %v1557_v53 = vld [vmem:[%s2101_s6 + $0xe0] sm:$0xff]   ;;  %v1561_v57 = vld [vmem:[%s2101_s6 + $0xe8] sm:$0xff]  }
  0xd5   : > { %v1555_v51 = vld [vmem:[%s2101_s6 + $0x98] sm:$0xff]   ;;  %v1558_v54 = vld [vmem:[%s2101_s6 + $0x20] sm:$0xff]   ;;  %v1562_v58 = vld [vmem:[%s2101_s6 + $0x28] sm:$0xff]  }
  0xd6   : > { %614 = vmatpush1.bf16.msra.mxu0 %v1518_v20  ;;  %665 = vmatpush1.bf16.msra.mxu1 %v1519_v21  ;;  %v1559_v55 = vld [vmem:[%s2101_s6 + $0xa0] sm:$0xff]   ;;  %v1563_v59 = vld [vmem:[%s2101_s6 + $0xa8] sm:$0xff]   ;;  %v1564_v60 = vld [vmem:[%s2101_s6 + $0x70] sm:$0xff]  }
  0xd7   : > { %615 = vmatprep.subr.bf16.mxu0 %v1520_v22  ;;  %666 = vmatprep.subr.bf16.mxu1 %v1522_v23  ;;  %v1565_v61 = vld [vmem:[%s2101_s6 + $0xf0] sm:$0xff]   ;;  %v1568_v0 = vld [vmem:[%s2101_s6 + $0x78] sm:$0xff]  }
  0xd8   : > { %v1566_v62 = vld [vmem:[%s2101_s6 + $0x30] sm:$0xff]   ;;  %v1569_v1 = vld [vmem:[%s2101_s6 + $0xf8] sm:$0xff]  }
  0xd9   : > { %v1567_v63 = vld [vmem:[%s2101_s6 + $0xb0] sm:$0xff]   ;;  %v1570_v2 = vld [vmem:[%s2101_s6 + $0x38] sm:$0xff]  }
  0xda   : > { %616 = vmatpush1.bf16.msra.mxu0 %v1524_v24  ;;  %667 = vmatpush1.bf16.msra.mxu1 %v1525_v25  ;;  %v413_v8 = vld [vmem:[%s313_s1] sm:$0xf] }
  0xdb   : > { %617 = vmatprep.subr.bf16.mxu0 %v1526_v26  ;;  %668 = vmatprep.subr.bf16.mxu1 %v1528_v27  ;;  %v418_v11 = vrot.slane %v413_v8, %v417_v6  ;;  %v426_v12 = vrot.slane %v413_v8, %v425_v7  ;;  %v422_v13 = vrot.slane %v413_v8, %v421_v9  ;;  %v719_v7 = vld [vmem:[#allocation2] sm:$0xff] }
  0xdc   : > { %v430_v14 = vrot.slane %v413_v8, %v429_v10 }
  0xde   : > { %618 = vmatpush1.bf16.msra.mxu0 %v1530_v28  ;;  %669 = vmatpush1.bf16.msra.mxu1 %v1531_v29 }
  0xdf   : > { %619 = vmatprep.subr.bf16.mxu0 %v1532_v30  ;;  %670 = vmatprep.subr.bf16.mxu1 %v1534_v31 }
  0xe2   : > { %620 = vmatpush1.bf16.msra.mxu0 %v1536_v32  ;;  %671 = vmatpush1.bf16.msra.mxu1 %v1537_v33 }
  0xe3   : > { %1333 = vmatprep.subr.bf16.mxu0 %v1540_v34  ;;  %1361 = vmatprep.subr.bf16.mxu1 %v1541_v35 }
  0xe5   : > { %638 = vmatmul.mubr.bf16.vlgmr.msra.gmra.mrb[0].mxu0 %v1538_v36  ;;  %689 = vmatmul.mubr.bf16.vlgmr.msra.gmra.mrb[0].mxu1 %v1538_v36 }
  0xe6   : > { %647 = vmatprep.mubr.bf16.mxu0 %v1822_v3  ;;  %698 = vmatprep.mubr.bf16.mxu1 %v1822_v3  ;;  %v1571_v3 = vld [vmem:[%s2101_s6 + $0xb8] sm:$0xff]  }
  0xe7   : > { %1334 = vmatpush3.bf16.msra.mxu0 %v1542_v37  ;;  %1362 = vmatpush3.bf16.msra.mxu1 %v1543_v38 }
  0xe8   : > { %1335 = vmatprep.subr.bf16.mxu0 %v1544_v39  ;;  %1363 = vmatprep.subr.bf16.mxu1 %v1545_v40 }
  0xeb   : > { %1336 = vmatpush3.bf16.msra.mxu0 %v1546_v41  ;;  %1364 = vmatpush3.bf16.msra.mxu1 %v1547_v42 }
  0xec   : > { %1337 = vmatprep.subr.bf16.mxu0 %v1548_v44  ;;  %1365 = vmatprep.subr.bf16.mxu1 %v1549_v45 }
  0xed   : > { %648 = vmatmul.mubr.bf16.gmra.mrb[4].mxu0 %v1539_v43  ;;  %699 = vmatmul.mubr.bf16.gmra.mrb[4].mxu1 %v1539_v43 }
  0xef   : > { %1338 = vmatpush3.bf16.msra.mxu0 %v1550_v46  ;;  %1366 = vmatpush3.bf16.msra.mxu1 %v1551_v47 }
  0xf0   : > { %1339 = vmatprep.subr.bf16.mxu0 %v1552_v48  ;;  %1367 = vmatprep.subr.bf16.mxu1 %v1553_v49 }
  0xf3   : > { %1340 = vmatpush3.bf16.msra.mxu0 %v1554_v50  ;;  %1368 = vmatpush3.bf16.msra.mxu1 %v1555_v51 }
  0xf4   : > { %1341 = vmatprep.subr.bf16.mxu0 %v1556_v52  ;;  %1369 = vmatprep.subr.bf16.mxu1 %v1557_v53 }
  0xf7   : > { %1342 = vmatpush3.bf16.msra.mxu0 %v1558_v54  ;;  %1370 = vmatpush3.bf16.msra.mxu1 %v1559_v55 }
  0xf8   : > { %1343 = vmatprep.subr.bf16.mxu0 %v1560_v56  ;;  %1371 = vmatprep.subr.bf16.mxu1 %v1561_v57 }
  0xfb   : > { %1344 = vmatpush3.bf16.msra.mxu0 %v1562_v58  ;;  %1372 = vmatpush3.bf16.msra.mxu1 %v1563_v59 }
  0xfc   : > { %1345 = vmatprep.subr.bf16.mxu0 %v1564_v60  ;;  %1373 = vmatprep.subr.bf16.mxu1 %v1565_v61 }
  0xff   : > { %1346 = vmatpush3.bf16.msra.mxu0 %v1566_v62  ;;  %1374 = vmatpush3.bf16.msra.mxu1 %v1567_v63 }
 0x100   : > { %1347 = vmatprep.subr.bf16.mxu0 %v1568_v0  ;;  %1375 = vmatprep.subr.bf16.mxu1 %v1569_v1 }
 0x103   : > { %1348 = vmatpush3.bf16.msra.mxu0 %v1570_v2  ;;  %1376 = vmatpush3.bf16.msra.mxu1 %v1571_v3 }
 0x1b8   : > { %v639_v15 = vpop.f32.mrb[0].mxu0  ;;  %v690_v16 = vpop.f32.mrb[0].mxu1 }
 0x1b9   : > { %v640_v17 = vadd.f32 %v639_v15, %v418_v11  ;;  %v691_v18 = vadd.f32 %v690_v16, %v426_v12  ;;  %v641_v19 = vpop.f32.mrb[1].mxu0  ;;  %v692_v20 = vpop.f32.mrb[1].mxu1 }
 0x1ba   : > { %v642_v21 = vadd.f32 %v641_v19, %v422_v13  ;;  %v693_v22 = vadd.f32 %v692_v20, %v430_v14  ;;  %v643_v23 = vpop.f32.mrb[2].mxu0  ;;  %v694_v24 = vpop.f32.mrb[2].mxu1 }
 0x1bb   : > { %v644_v25 = vadd.f32 %v643_v23, %v418_v11  ;;  %v695_v26 = vadd.f32 %v694_v24, %v426_v12  ;;  %v645_v27 = vpop.f32.mrb[3].mxu0  ;;  %v696_v28 = vpop.f32.mrb[3].mxu1  ;;  %v707_v31 = vmax.f32 %v640_v17, 0.0  ;;  %v709_v32 = vmax.f32 %v691_v18, 0.0 }
 0x1bc   : > { %v646_v29 = vadd.f32 %v645_v27, %v422_v13  ;;  %v697_v30 = vadd.f32 %v696_v28, %v430_v14  ;;  %v708_v35 = vmax.f32 %v642_v21, 0.0  ;;  %v710_v36 = vmax.f32 %v693_v22, 0.0 }
 0x1bd   : > { %v711_v33 = vmax.f32 %v644_v25, 0.0  ;;  %v713_v34 = vmax.f32 %v695_v26, 0.0  ;;  %v721_v25 = vld [vmem:[#allocation2 + $0x10] sm:$0xff] }
 0x1be   : > { %v712_v37 = vmax.f32 %v646_v29, 0.0  ;;  %v714_v38 = vmax.f32 %v697_v30, 0.0 }
 0x1bf   : > { %v722_v39 = vpack.c.bf16 %v711_v33, %v707_v31  ;;  %v724_v40 = vpack.c.bf16 %v713_v34, %v709_v32 }
 0x1c0   : > { %v723_v41 = vpack.c.bf16 %v712_v37, %v708_v35  ;;  %v725_v42 = vpack.c.bf16 %v714_v38, %v710_v36  ;;  %v649_v43 = vpop.f32.mrb[4].mxu0  ;;  %v700_v44 = vpop.f32.mrb[4].mxu1 }
 0x1c1   : > { %v650_v45 = vadd.f32 %v649_v43, %v418_v11  ;;  %v701_v46 = vadd.f32 %v700_v44, %v426_v12  ;;  %v651_v47 = vpop.f32.mrb[5].mxu0  ;;  %v702_v48 = vpop.f32.mrb[5].mxu1 }
 0x1c2   : > { %v652_v49 = vadd.f32 %v651_v47, %v422_v13  ;;  %v703_v50 = vadd.f32 %v702_v48, %v430_v14  ;;  %v653_v51 = vpop.f32.mrb[6].mxu0  ;;  %v704_v52 = vpop.f32.mrb[6].mxu1  ;;  %1018 = vmatprep.mubr.bf16.mxu0 %v723_v41  ;;  %1066 = vmatprep.mubr.bf16.mxu1 %v725_v42  ;;  %v720_v13 = vld [vmem:[#allocation2 + $0x8] sm:$0xff] }
 0x1c3   : > { %v654_v53 = vpop.f32.mrb[7].mxu0  ;;  %v705_v54 = vpop.f32.mrb[7].mxu1  ;;  %1019 = vmatmul.mubr.bf16.vlgmr.msra.gmra.mrb[8].mxu0 %v722_v39  ;;  %1067 = vmatmul.mubr.bf16.vlgmr.msra.gmra.mrb[8].mxu1 %v724_v40  ;;  %v715_v57 = vmax.f32 %v650_v45, 0.0  ;;  %v717_v58 = vmax.f32 %v701_v46, 0.0 }
 0x1c4   : > { %v716_v55 = vmax.f32 %v652_v49, 0.0  ;;  %v718_v56 = vmax.f32 %v703_v50, 0.0 }
 0x1c5   : > { %v726_v61 = vpack.c.bf16 %v715_v57, %v715_v57  ;;  %v728_v62 = vpack.c.bf16 %v717_v58, %v717_v58 }
 0x1c6   : > { %v727_v59 = vpack.c.bf16 %v716_v55, %v716_v55  ;;  %v729_v60 = vpack.c.bf16 %v718_v56, %v718_v56 }
 0x1c8   : > { %1026 = vmatprep.mubr.bf16.mxu0 %v727_v59  ;;  %1074 = vmatprep.mubr.bf16.mxu1 %v729_v60 }
 0x1cb   : > { %1027 = vmatmul.mubr.bf16.gmra.mrb[12].mxu0 %v726_v61  ;;  %1075 = vmatmul.mubr.bf16.gmra.mrb[12].mxu1 %v728_v62 }
 0x296   : > { %v1349_v63 = vpop.f32.mrb[8].mxu0  ;;  %v1377_v0 = vpop.f32.mrb[8].mxu1 }
 0x297   : > { %v1350_v1 = vpop.f32.mrb[9].mxu0  ;;  %v1378_v2 = vpop.f32.mrb[9].mxu1 }
 0x298   : > { %v1351_v3 = vadd.f32 %v1350_v1, %v1349_v63  ;;  %v1379_v4 = vadd.f32 %v1378_v2, %v1377_v0  ;;  %v1352_v5 = vpop.f32.mrb[10].mxu0  ;;  %v1380_v6 = vpop.f32.mrb[10].mxu1 }
 0x299   : > { %v1353_v8 = vpop.f32.mrb[11].mxu0  ;;  %v1381_v9 = vpop.f32.mrb[11].mxu1 }
 0x29a   : > { %v1069_v10 = vadd.f32 %v1379_v4, %v1351_v3  ;;  %v1354_v11 = vadd.f32 %v1353_v8, %v1352_v5  ;;  %v1382_v12 = vadd.f32 %v1381_v9, %v1380_v6 }
 0x29c   : > { %v1082_v14 = vadd.f32 %v1069_v10, %v719_v7  ;;  %v1072_v15 = vadd.f32 %v1382_v12, %v1354_v11 }
 0x29e   : > { %1085 = vst [vmem:[#allocation2] sm:$0xff] %v1082_v14  ;;  %v1083_v16 = vadd.f32 %v1072_v15, %v720_v13  ;;  %v1355_v17 = vpop.f32.mrb[12].mxu0  ;;  %v1383_v18 = vpop.f32.mrb[12].mxu1 }
 0x29f   : > { %v1356_v19 = vpop.f32.mrb[13].mxu0  ;;  %v1384_v20 = vpop.f32.mrb[13].mxu1 }
 0x2a0   : > { %1086 = vst [vmem:[#allocation2 + $0x8] sm:$0xff] %v1083_v16  ;;  %v1357_v21 = vadd.f32 %v1356_v19, %v1355_v17  ;;  %v1385_v22 = vadd.f32 %v1384_v20, %v1383_v18  ;;  %v1358_v23 = vpop.f32.mrb[14].mxu0  ;;  %v1386_v24 = vpop.f32.mrb[14].mxu1  ;;  %1091 = sbr.rel (%p1325_p12) target bundleno = 687 (0x2af), region = 68 }
 0x2a1   : > { %v1359_v26 = vpop.f32.mrb[15].mxu0  ;;  %v1387_v27 = vpop.f32.mrb[15].mxu1 }
 0x2a2   : > { %v1077_v28 = vadd.f32 %v1385_v22, %v1357_v21 }
 0x2a4   : > { %v1084_v29 = vadd.f32 %v1077_v28, %v721_v25 }
 0x2a5   : > { %v1092_v30 = vld [vmem:[#allocation2] sm:$0xff] (!%p1325_p12) }
 0x2a6   : > { %1087 = vst [vmem:[#allocation2 + $0x10] sm:$0xff] %v1084_v29  ;;  %1095 = vst [vmem:[#allocation12] sm:$0xff] (!%p1325_p12), %v1092_v30 }
 0x2a7   : > { %v1093_v31 = vld [vmem:[#allocation2 + $0x8] sm:$0xff] }
 0x2a8   : > { %1096 = vst [vmem:[#allocation12 + $0x8] sm:$0xff] %v1093_v31 }
 0x2ad   : > { %v1094_v32 = vld [vmem:[#allocation2 + $0x10] sm:$0xff] }
 0x2ae   : > { %1097 = vst [vmem:[#allocation12 + $0x10] sm:$0xff] %v1094_v32 }
 0x2af PF: > { %p1429_p11 = scmp.eq.s32.totalorder %s1885_s24, 1  ;;  %s1823_s30 = smov [#allocation12]  }
 0x2b0   : > { %s1107_s25 = sshll.u32 %s1823_s30, 4  ;;  %s1108_s25 = int_to_ptr.vmem [resolvable:$true] %s1107_s25 }
 0x2b1   : > { %s1718_s8 = scalar_lea.vmem %s1108_s25, 384  ;;  %p1725_p6 = scmp.lt.s32.totalorder %s1108_s25, %s1108_s25 }
 0x2b2   : > { %p1719_p0 = scmp.ne.s32.totalorder %s1108_s25, %s1718_s8  ;;  %p1726_p8 = scmp.lt.s32.totalorder %s1718_s8, %s1718_s8 }
 0x2b4   : > { %p1720_p7 = pnand %p1719_p0, %p1429_p11  ;;  %p1727_p13 = por %p1726_p8, %p1725_p6 }
 0x2b6   : > { %p1721_p10 = pneg %p1720_p7 }
 0x2b8   : > { %p1728_p3 = pnand %p1727_p13, %p1721_p10 }
 0x2ba   : > { %1731 = shalt.err (!%p1728_p3)
}
 0x2bb   : > { %s2273_s29 = sld [smem:[#allocation23_spill]] }
 0x2c1   : > { %s1732_s12 = scalar_lea.hbm %s2273_s29, 384 }
 0x2c2   : > { %p1733_p1 = scmp.ne.s32.totalorder %s2273_s29, %s1732_s12  ;;  %p1738_p5 = scmp.lt.u32.totalorder %s1732_s12, %s2273_s29 }
 0x2c4   : > { %p1734_p4 = pnand %p1733_p1, %p1429_p11 }
 0x2c6   : > { %p1735_p9 = pneg %p1734_p4 }
 0x2c8   : > { %p1740_p2 = pnand %p1738_p5, %p1735_p9 }
 0x2ca   : > { %1743 = shalt.err (!%p1740_p2)
}
 0x2cb   : > { %s1824_s13 = smov 128   ;;  %s1825_s7 = smov 8  }
 0x2cc   : > { %1404 = dma.vmem_to_hbm [thread:$0]  (%p1429_p11), %s1108_s25, 384, %s2273_s29, [#allocation5], %s1824_s13, %s1824_s13, %s1825_s7  }
 0x2cd   : > { %1785 = dma.done.wait (%p1429_p11), [#allocation5], 384  }
 0x2ce   : > { %1787 = vsyncadd (%p1429_p11), [#allocation5], 4294966912 }
 0x2cf PF: > { %s23_s23 = sadd.s32 1, %s1810_s23   ;;  %s2274_s15 = sld [smem:[#allocation20_spill]] }
 0x2d0   : > { %p20_p12 = scmp.ge.s32.totalorder %s23_s23, 4   ;;  %s2275_s27 = sld [smem:[#allocation19_spill]] }
 0x2d1   : > { %s2276_s18 = smov %s1794_s19  ;;  %s2277_s19 = smov %s1798_s20 }
 0x2d2   : > { %s2279_s21 = smov %s1806_s22  ;;  %22 = sbr.rel (!%p20_p12) target bundleno = 12 (0xc), region = 120 }
 0x2d5   : > { %s2278_s20 = smov %s2274_s15 }
 0x2d6   : > { %s2280_s22 = smov %s2275_s27 }
 0x2d9   :  { %1123 = vsyncpa [#allocation4], 1 }
 0x2da   :  { %1125 = vsyncpa [#allocation4 + $0x1], 1 }
 0x2db   :  { %1126 = vsyncpa [#allocation7], 1 }
 0x2dc   :  { %1128 = vsyncpa [#allocation7 + $0x1], 1 }
 0x2dd   :  { %1129 = vsyncpa [#allocation10], 1 }
 0x2de   :  { %1131 = vsyncpa [#allocation10 + $0x1], 1 }
 0x2df   :  { %1132 = vsyncpa [#allocation5], 1 }
 0x2e0   :  { %1134 = vsyncpa [#allocation5 + $0x1], 1 }

</bundles_post_ra>
